<compile_context>
chip_gen: v5e
topology: v5e:2x2
jax: 0.10.0
libtpu: 0.0.40
codegen_flags: <defaults>
</compile_context>

<pallas_src>
import numpy as np
import jax
import jax.numpy as jnp
from jax.experimental import pallas as pl
from jax.experimental.pallas import tpu as pltpu


def calculate_order(offsets, order, upscale_factor):
    """Numpy port of the torch helper: traversal order of the r^3 sub-voxels."""
    coord_map = {'x': 0, 'y': 1, 'z': 2}
    vals = np.zeros(offsets.shape[0], dtype=np.float64)
    for i, coord in enumerate(order):
        vals = vals + offsets[:, coord_map[coord]].astype(np.float64) * upscale_factor ** (2 - i)
    return np.argsort(vals)


def _layout_offsets(upscale_factor, layout_style):
    r = upscale_factor
    ii, jj, kk = np.meshgrid(np.arange(r), np.arange(r), np.arange(r), indexing='ij')
    offs = np.stack((ii, jj, kk), -1).reshape(-1, 3)
    return offs[calculate_order(offs, layout_style, r)].astype(np.int32)


def _build_table(upscale_factor, layout_style):
    """(8, volume*4) int32 table.  For lane l = v*4 + c:
         out[p, l] = b*T[0,l] + x*T[1,l] + y*T[2,l] + z*T[3,l] + T[4,l]
       which yields [batch, x*r + off_x[v], y*r + off_y[v], z*r + off_z[v]]."""
    r = upscale_factor
    volume = r ** 3
    offs = _layout_offsets(r, layout_style)              # (volume, 3), layout-ordered
    tbl = np.zeros((8, volume * 4), dtype=np.int32)
    for v in range(volume):
        base = 4 * v
        tbl[0, base + 0] = 1                              # batch passthrough
        tbl[1, base + 1] = r                              # x scale
        tbl[2, base + 2] = r                              # y scale
        tbl[3, base + 3] = r                              # z scale
        tbl[4, base + 1] = offs[v, 0]                     # x offset
        tbl[4, base + 2] = offs[v, 1]                     # y offset
        tbl[4, base + 3] = offs[v, 2]                     # z offset
    return tbl


def _voxel_shuffle_idx_kernel(idx_ref, tbl_ref, out_ref):
    # idx_ref: (TM, 4) int32 [batch, x, y, z] -- points on sublanes.
    # tbl_ref: (8, volume*4) int32 layout table (rows 0..4 used).
    # out_ref: (TM, volume*4) int32 -- row p is the volume new indices of point
    #          p flattened as [b, x', y', z'] * volume  (free reshape outside).
    idx = idx_ref[...]
    tbl = tbl_ref[...]
    b = idx[:, 0:1]
    x = idx[:, 1:2]
    y = idx[:, 2:3]
    z = idx[:, 3:4]
    out_ref[...] = (b * tbl[0:1, :] + x * tbl[1:2, :] + y * tbl[2:3, :]
                    + z * tbl[3:4, :] + tbl[4:5, :])


def _round_up(v, m):
    return ((v + m - 1) // m) * m


_VMEM_BUDGET = 24 * 1024 * 1024   # kernel working-set target (fits every TPU gen)
_VMEM_LIMIT = 40 * 1024 * 1024    # scoped-VMEM limit (lifts v5e's 16 MiB default)


def _choose_tile(n_pts, volume, block_points):
    # Per-point VMEM bytes: double-buffered input (lane-padded to 128) + output.
    lane_out = max(4 * volume, 128)
    per_pt = 2 * 4 * (128 + lane_out)
    cap = max(128, (_VMEM_BUDGET // per_pt) // 128 * 128)
    tm = max(128, min(_round_up(int(block_points), 128), cap))
    if n_pts <= tm:
        if n_pts > 4096:
            # v7x megacore: keep >= 2 grid steps so both TensorCores get work.
            tm = _round_up(pl.cdiv(n_pts, 2), 128)
        else:
            tm = _round_up(max(n_pts, 8), 8)
    return tm


def voxel_shuffle(features, indices, spatial_shape, batch_size,
                  upscale_factor=2, pairing_style='sequential', layout_style='xyz',
                  block_points=16384, build_index_map=False):
    assert pairing_style in ('sequential', 'strided'), \
        "Only support style: 'sequential' or 'strided'"
    n_pts, n_chan = features.shape
    r = int(upscale_factor)
    volume = r ** 3
    assert n_chan % volume == 0, 'Number of channels must be divisible by upscale_factor^3'
    oc = n_chan // volume
    new_shape = (spatial_shape[0] * r, spatial_shape[1] * r, spatial_shape[2] * r)

    # ---- features: pure relayout, no kernel / no extra HBM traffic ---------
    if pairing_style == 'sequential':
        new_features = features.reshape(n_pts * volume, oc)        # free bitcast
    else:  # 'strided' (matches torch: view(oc, N, vol).permute(0, 2, 1).reshape)
        # TODO(synk): this materializes a full N*C transpose in XLA; if strided
        # mode is used at scale it should become its own lane-dense Pallas
        # relayout (or be fused into the consumer) -- it dwarfs the index kernel.
        new_features = jnp.transpose(
            features.reshape(oc, n_pts, volume), (0, 2, 1)).reshape(n_pts * volume, oc)

    # ---- indices: Pallas kernel, points on sublanes, (v, c) on lanes -------
    if indices.dtype != jnp.int32:
        indices = indices.astype(jnp.int32)

    lanes = 4 * volume
    tbl = jnp.asarray(_build_table(r, layout_style))                # (8, lanes)
    tm = _choose_tile(n_pts, volume, block_points)
    grid = (pl.cdiv(n_pts, tm),)

    out2d = pl.pallas_call(
        _voxel_shuffle_idx_kernel,
        out_shape=jax.ShapeDtypeStruct((n_pts, lanes), jnp.int32),
        grid=grid,
        in_specs=[pl.BlockSpec((tm, 4), lambda n: (n, 0)),
                  pl.BlockSpec((8, lanes), lambda n: (0, 0))],
        out_specs=pl.BlockSpec((tm, lanes), lambda n: (n, 0)),
        compiler_params=pltpu.CompilerParams(
            dimension_semantics=("parallel",),
            vmem_limit_bytes=_VMEM_LIMIT),
    )(indices, tbl)

    # (N, volume*4) -> (N*volume, 4): row-major identity reshape (free).
    new_indices = out2d.reshape(n_pts * volume, 4)

    # ---- optional host-side metadata dict (deferred by default) ------------
    # TODO(synk): index_map is host metadata only; building it forces a
    # device->host sync, so it is opt-in rather than always-on like torch.
    index_map = None
    if build_index_map:
        orig_np = np.asarray(indices)
        new_np = np.asarray(new_indices).reshape(n_pts, volume, 4)
        index_map = {}
        for orig, news in zip(orig_np.tolist(), new_np.tolist()):
            index_map.setdefault(tuple(orig), []).extend(news)

    return (new_features, new_indices, new_shape, batch_size), index_map


if __name__ == "__main__":
    key = jax.random.PRNGKey(0)

    def reference(features, indices, r, layout, pairing):
        feat = np.asarray(features)
        idx = np.asarray(indices, dtype=np.int32)
        n, c = feat.shape
        vol = r ** 3
        oc = c // vol
        if pairing == 'sequential':
            ref_feat = feat.reshape(n * vol, oc)
        else:  # mirror torch view/permute/contiguous/view
            ref_feat = np.ascontiguousarray(
                np.transpose(feat.reshape(oc, n, vol), (0, 2, 1))).reshape(n * vol, oc)
        offs = _layout_offsets(r, layout)
        ref_idx = np.repeat(idx, vol, axis=0)
        ref_idx[:, 1:] = ref_idx[:, 1:] * r + np.tile(offs, (n, 1))
        return ref_feat, ref_idx

    def run_case(N, C, r, batch_size, spatial, layout, pairing, block_points=16384):
        k1, k2, k3 = jax.random.split(jax.random.fold_in(key, N * 131 + r * 7 + C), 3)
        features = jax.random.normal(k1, (N, C), dtype=jnp.float32)
        batch_ids = jax.random.randint(k2, (N, 1), 0, batch_size, dtype=jnp.int32)
        coords = jax.random.randint(k3, (N, 3), 0, min(spatial), dtype=jnp.int32)
        indices = jnp.concatenate([batch_ids, coords], axis=1)

        (new_feat, new_idx, new_shape, bs), index_map = voxel_shuffle(
            features, indices, spatial, batch_size, upscale_factor=r,
            pairing_style=pairing, layout_style=layout,
            block_points=block_points, build_index_map=True)
        jax.block_until_ready((new_feat, new_idx))

        ref_feat, ref_idx = reference(features, indices, r, layout, pairing)
        assert np.array_equal(np.asarray(new_feat), ref_feat), 'feature mismatch'
        assert np.array_equal(np.asarray(new_idx), ref_idx), 'index mismatch'
        assert tuple(new_shape) == tuple(s * r for s in spatial) and bs == batch_size
        assert index_map is not None and len(index_map) <= N

    # Module defaults: sequential / xyz, single block.
    run_case(N=16, C=64, r=2, batch_size=2, spatial=(8, 8, 8),
             layout='xyz', pairing='sequential')
    # Multi-block grid with a ragged tail block and non-default layout order.
    run_case(N=200, C=64, r=2, batch_size=2, spatial=(16, 16, 16),
             layout='zxy', pairing='sequential', block_points=128)
    # Non-power-of-two upscale factor (r=3, volume=27) + strided pairing.
    run_case(N=40, C=54, r=3, batch_size=3, spatial=(8, 8, 8),
             layout='yzx', pairing='strided')
    # r=4 (256-lane output blocks) + strided pairing.
    run_case(N=24, C=64, r=4, batch_size=2, spatial=(4, 4, 4),
             layout='xzy', pairing='strided')

    print("KERNEL_OK")
</pallas_src>

<mosaic_0001>
module attributes {stable_mosaic.version = 11 : i64} {
  func.func @_voxel_shuffle_idx_kernel(%arg0: i32, %arg1: memref<16x4xi32, #tpu.memory_space<vmem>>, %arg2: memref<8x32xi32, #tpu.memory_space<vmem>>, %arg3: memref<16x32xi32, #tpu.memory_space<vmem>>) attributes {dimension_semantics = [#tpu.dimension_semantics<parallel>], iteration_bounds = array<i64: 1>, scalar_prefetch = 0 : i64, scratch_operands = 0 : i64, tpu.core_type = #tpu.core_type<tc>, window_params = [{transform_indices = @transform_0, window_bounds = array<i64: 16, 4>}, {pipeline_mode = #tpu.pipeline_mode<synchronous>, transform_indices = @transform_1, window_bounds = array<i64: 8, 32>}, {transform_indices = @transform_2, window_bounds = array<i64: 16, 32>}]} {
    %c0 = arith.constant 0 : index
    %c0_0 = arith.constant 0 : index
    %0 = vector.load %arg1[%c0, %c0_0] : memref<16x4xi32, #tpu.memory_space<vmem>>, vector<16x4xi32>
    %c0_1 = arith.constant 0 : index
    %c0_2 = arith.constant 0 : index
    %1 = vector.load %arg2[%c0_1, %c0_2] : memref<8x32xi32, #tpu.memory_space<vmem>>, vector<8x32xi32>
    %2 = vector.extract_strided_slice %0 {offsets = [0, 0], sizes = [16, 1], strides = [1, 1]} : vector<16x4xi32> to vector<16x1xi32>
    %3 = vector.extract_strided_slice %0 {offsets = [0, 1], sizes = [16, 1], strides = [1, 1]} : vector<16x4xi32> to vector<16x1xi32>
    %4 = vector.extract_strided_slice %0 {offsets = [0, 2], sizes = [16, 1], strides = [1, 1]} : vector<16x4xi32> to vector<16x1xi32>
    %5 = vector.extract_strided_slice %0 {offsets = [0, 3], sizes = [16, 1], strides = [1, 1]} : vector<16x4xi32> to vector<16x1xi32>
    %6 = vector.extract_strided_slice %1 {offsets = [0, 0], sizes = [1, 32], strides = [1, 1]} : vector<8x32xi32> to vector<1x32xi32>
    %7 = vector.broadcast %2 : vector<16x1xi32> to vector<16x32xi32>
    %8 = vector.broadcast %6 : vector<1x32xi32> to vector<16x32xi32>
    %9 = arith.muli %7, %8 : vector<16x32xi32>
    %10 = vector.extract_strided_slice %1 {offsets = [1, 0], sizes = [1, 32], strides = [1, 1]} : vector<8x32xi32> to vector<1x32xi32>
    %11 = vector.broadcast %3 : vector<16x1xi32> to vector<16x32xi32>
    %12 = vector.broadcast %10 : vector<1x32xi32> to vector<16x32xi32>
    %13 = arith.muli %11, %12 : vector<16x32xi32>
    %14 = arith.addi %9, %13 : vector<16x32xi32>
    %15 = vector.extract_strided_slice %1 {offsets = [2, 0], sizes = [1, 32], strides = [1, 1]} : vector<8x32xi32> to vector<1x32xi32>
    %16 = vector.broadcast %4 : vector<16x1xi32> to vector<16x32xi32>
    %17 = vector.broadcast %15 : vector<1x32xi32> to vector<16x32xi32>
    %18 = arith.muli %16, %17 : vector<16x32xi32>
    %19 = arith.addi %14, %18 : vector<16x32xi32>
    %20 = vector.extract_strided_slice %1 {offsets = [3, 0], sizes = [1, 32], strides = [1, 1]} : vector<8x32xi32> to vector<1x32xi32>
    %21 = vector.broadcast %5 : vector<16x1xi32> to vector<16x32xi32>
    %22 = vector.broadcast %20 : vector<1x32xi32> to vector<16x32xi32>
    %23 = arith.muli %21, %22 : vector<16x32xi32>
    %24 = arith.addi %19, %23 : vector<16x32xi32>
    %25 = vector.extract_strided_slice %1 {offsets = [4, 0], sizes = [1, 32], strides = [1, 1]} : vector<8x32xi32> to vector<1x32xi32>
    %26 = vector.broadcast %25 : vector<1x32xi32> to vector<16x32xi32>
    %27 = arith.addi %24, %26 : vector<16x32xi32>
    %c0_3 = arith.constant 0 : index
    %c0_4 = arith.constant 0 : index
    %28 = vector.load %arg3[%c0_3, %c0_4] : memref<16x32xi32, #tpu.memory_space<vmem>>, vector<16x32xi32>
    tpu.vector_store %arg3[%c0_3, %c0_4], %27 {strides = array<i32>} : memref<16x32xi32, #tpu.memory_space<vmem>>, vector<16x32xi32>,
    return
  }
  func.func @transform_0(%arg0: i32) -> (i32, i32) {
    %c0_i32 = arith.constant 0 : i32
    %c0_i32_0 = arith.constant 0 : i32
    return %arg0, %c0_i32 : i32, i32
  }
  func.func @transform_1(%arg0: i32) -> (i32, i32) {
    %c0_i32 = arith.constant 0 : i32
    %c0_i32_0 = arith.constant 0 : i32
    %c0_i32_1 = arith.constant 0 : i32
    return %c0_i32, %c0_i32_0 : i32, i32
  }
  func.func @transform_2(%arg0: i32) -> (i32, i32) {
    %c0_i32 = arith.constant 0 : i32
    %c0_i32_0 = arith.constant 0 : i32
    return %arg0, %c0_i32 : i32, i32
  }
}

</mosaic_0001>

<bundles_post_ra>
// kernel: tpu_custom_call.1
= control target key start
LH: loop header
LB: loop body
LE: loop exit
PB: predicated region body
PF: predicated region fallthrough
CT: control target
= control target key end

     0   :  { %v119_v1 = vmov 1   ;;  %v120_v2 = vmov 0   ;;  %s153_s0 = inlined_call_operand.vmem [shape: s32[16,4], index: 0, kind: input, shape index: {}]   ;;  %s154_s1 = inlined_call_operand.vmem [shape: s32[8,32], index: 1, kind: input, shape index: {}]   ;;  %s155_s2 = inlined_call_operand.hbm [shape: s32[16,32], index: 2, kind: output, shape index: {}]  }
   0x1   :  { %v12_v0 = vld [vmem:[%s153_s0] sm:$0xff]  ;;  %89 = vset.pattern.permute.xlu1 %v119_v1  ;;  %88 = vset.pattern.permute.xlu0 %v120_v2 }
   0x2   :  { %7 = vsyncpa [#allocation3], 0  ;;  %25 = vperm.xlu1 %89, %v12_v0   ;;  %16 = vperm.xlu0 %88, %v12_v0   ;;  %v121_v3 = vmov 2   ;;  %v13_v4 = vld [vmem:[%s153_s0 + $0x8] sm:$0xff]  ;;  %v122_v5 = vmov 3   ;;  %v14_v8 = vld [vmem:[%s154_s1] sm:$0xff] }
   0x3   :  { %90 = vset.pattern.permute.xlu2 %v121_v3  ;;  %v30_v10 = vperm.slane %v14_v8, 1  ;;  %v21_v11 = vperm.slane %v14_v8, 0  ;;  %v41_v14 = vperm.slane %v14_v8, 2  ;;  %v52_v23 = vperm.slane %v14_v8, 3  ;;  %s123_s0 = smov [#allocation2]   ;;  %s69_s17 = sshll.u32 %s155_s2, 4  ;;  %s70_s17 = int_to_ptr.hbm [resolvable:$true] %s69_s17 }
   0x4   :  { %36 = vperm.xlu2 %90, %v12_v0   ;;  %v57_v25 = vperm.slane %v14_v8, 4  ;;  %s67_s1 = sshll.u32 %s123_s0, 4  ;;  %vm60_vm0 = vcmask 261120   ;;  %s124_s18 = smov 128   ;;  %s68_s1 = int_to_ptr.vmem [resolvable:$true] %s67_s1 }
   0x5   :  { %s125_s19 = smov 8  }
   0xa   :  { %28 = vperm.xlu1 %89, %v13_v4   ;;  %19 = vperm.xlu0 %88, %v13_v4  }
   0xc   :  { %39 = vperm.xlu2 %90, %v13_v4  }
  0x12   :  { %92 = vset.pattern.permute.xlu1 %v122_v5  ;;  %91 = vset.pattern.permute.xlu0 %v122_v5 }
  0x13   :  { %50 = vperm.xlu1 %92, %v13_v4   ;;  %47 = vperm.xlu0 %91, %v12_v0  }
  0x5e   :  { %v37_v9 = vpop.permute.xlu2 %36 }
  0x5f   :  { %v42_v20 = vmul.u32 %v41_v14, %v37_v9 }
  0x66   :  { %v40_v19 = vpop.permute.xlu2 %39 }
  0x67   :  { %v43_v24 = vmul.u32 %v41_v14, %v40_v19 }
  0x74   :  { %v26_v6 = vpop.permute.xlu1 %25  ;;  %v17_v7 = vpop.permute.xlu0 %16 }
  0x75   :  { %v31_v15 = vmul.u32 %v30_v10, %v26_v6  ;;  %v22_v16 = vmul.u32 %v21_v11, %v17_v7 }
  0x77   :  { %v33_v21 = vadd.s32 %v31_v15, %v22_v16 }
  0x79   :  { %v44_v30 = vadd.s32 %v42_v20, %v33_v21 }
  0x7c   :  { %v29_v12 = vpop.permute.xlu1 %28  ;;  %v20_v13 = vpop.permute.xlu0 %19 }
  0x7d   :  { %v32_v17 = vmul.u32 %v30_v10, %v29_v12  ;;  %v23_v18 = vmul.u32 %v21_v11, %v20_v13 }
  0x7f   :  { %v34_v22 = vadd.s32 %v32_v17, %v23_v18 }
  0x81   :  { %v45_v28 = vadd.s32 %v43_v24, %v34_v22 }
  0x85   :  { %v51_v26 = vpop.permute.xlu1 %50  ;;  %v48_v27 = vpop.permute.xlu0 %47 }
  0x86   :  { %v54_v29 = vmul.u32 %v52_v23, %v51_v26  ;;  %v53_v31 = vmul.u32 %v52_v23, %v48_v27 }
  0x88   :  { %v56_v32 = vadd.s32 %v54_v29, %v45_v28  ;;  %v55_v33 = vadd.s32 %v53_v31, %v44_v30 }
  0x8a   :  { %v59_v34 = vadd.s32 %v57_v25, %v56_v32  ;;  %v58_v35 = vadd.s32 %v57_v25, %v55_v33 }
  0x8c   :  { %62 = vst.msk [vmem:[#allocation2 + $0x8] sm:$0xff] %vm60_vm0, %v59_v34 }
  0x8d   :  { %61 = vst.msk [vmem:[#allocation2] sm:$0xff] %vm60_vm0, %v58_v35 }
  0x8e   :  { %75 = dma.vmem_to_hbm [thread:$0]  %s68_s1, 256, %s70_s17, [#allocation3], %s124_s18, %s124_s18, %s125_s19  }
  0x8f   :  { %117 = dma.done.wait [#allocation3], 256  }
  0x90   :  { %118 = vsyncadd [#allocation3], 4294967040 }
  0x91   :  { %80 = vsyncpa [#allocation3], 1 }

</bundles_post_ra>
